<compile_context>
chip_gen: v5e
topology: v5e:2x2
jax: 0.10.0
libtpu: 0.0.40
codegen_flags: <defaults>
</compile_context>

<pallas_src>
import math
from functools import partial

import jax
import jax.numpy as jnp
from jax.experimental import pallas as pl
from jax.experimental.pallas import tpu as pltpu


# ---------------------------------------------------------------------------
# small in-kernel helpers
# ---------------------------------------------------------------------------
def _layernorm(x, w, b, eps=1e-5):
    x = x.astype(jnp.float32)
    mu = jnp.mean(x, axis=-1, keepdims=True)
    var = jnp.mean((x - mu) ** 2, axis=-1, keepdims=True)
    return (x - mu) * jax.lax.rsqrt(var + eps) * w + b


# ---------------------------------------------------------------------------
# Kernel 1: the whole text Transformer (all ResidualAttentionBlocks, mode='global':
# no dropout / drop_path).  grid = (batch, layer); activations stay VMEM-resident
# across layers, per-layer weights are streamed.
# ---------------------------------------------------------------------------
def _transformer_kernel(n_head,
                        x_ref, mask_ref,
                        ln1w_ref, ln1b_ref, inw_ref, inb_ref, outw_ref, outb_ref,
                        ln2w_ref, ln2b_ref, fcw_ref, fcb_ref, pjw_ref, pjb_ref,
                        o_ref, x_acc):
    layer = pl.program_id(1)

    # load the input sequence once per batch element (layer 0 only)
    @pl.when(layer == 0)
    def _():
        x_acc[...] = x_ref[0].astype(jnp.float32)

    x = x_acc[...]                          # (L, D), f32, resident across layers
    L, D = x.shape
    hd = D // n_head
    scale = 1.0 / math.sqrt(hd)
    mask = mask_ref[...]                    # (L, L) additive causal mask (0 / -inf)

    # ---- multi-head self-attention branch ----
    h = _layernorm(x, ln1w_ref[0], ln1b_ref[0])
    # fused QKV: one (L, D) x (D, 3D) MXU pass instead of three narrow matmuls
    qkv = jnp.dot(h, inw_ref[0], preferred_element_type=jnp.float32) + inb_ref[0]   # (L, 3D)

    # head-batched operands (H, L, hd); built from cheap 2-D lane slices
    qh = jnp.stack([qkv[:, i * hd:(i + 1) * hd] for i in range(n_head)], axis=0) * scale
    kh = jnp.stack([qkv[:, D + i * hd:D + (i + 1) * hd] for i in range(n_head)], axis=0)
    vh = jnp.stack([qkv[:, 2 * D + i * hd:2 * D + (i + 1) * hd] for i in range(n_head)], axis=0)

    # batched S = Q K^T and P @ V over all heads at once
    s = jnp.einsum('hqd,hkd->hqk', qh, kh, preferred_element_type=jnp.float32) + mask[None]
    s = s - jnp.max(s, axis=-1, keepdims=True)
    e = jnp.exp(s)
    p = e * pl.reciprocal(jnp.sum(e, axis=-1, keepdims=True), approx=True)
    ctx = jnp.einsum('hqk,hkd->hqd', p, vh, preferred_element_type=jnp.float32)      # (H, L, hd)

    # concat heads back on the lane axis, ONE (L, D) x (D, D) output projection
    ctx2 = jnp.concatenate([ctx[i] for i in range(n_head)], axis=-1)                 # (L, D)
    attn = jnp.dot(ctx2, outw_ref[0], preferred_element_type=jnp.float32) + outb_ref[0]
    x = x + attn

    # ---- MLP branch (c_fc -> QuickGELU -> c_proj) ----
    h2 = _layernorm(x, ln2w_ref[0], ln2b_ref[0])
    a = jnp.dot(h2, fcw_ref[0], preferred_element_type=jnp.float32) + fcb_ref[0]     # (L, 4D)
    a = a * jax.nn.sigmoid(1.702 * a)                                                # QuickGELU
    x = x + jnp.dot(a, pjw_ref[0], preferred_element_type=jnp.float32) + pjb_ref[0]

    x_acc[...] = x

    @pl.when(layer == pl.num_programs(1) - 1)
    def _():
        o_ref[0] = x.astype(o_ref.dtype)


def transformer_forward(x, mask, bp, n_head):
    """x: (B, L, D). bp: dict of per-layer weights stacked on a leading layer dim."""
    B, L, D = x.shape
    n_layers = bp['in_w'].shape[0]
    w_names = ('ln1_w', 'ln1_b', 'in_w', 'in_b', 'out_w', 'out_b',
               'ln2_w', 'ln2_b', 'fc_w', 'fc_b', 'proj_w', 'proj_b')
    weights = tuple(bp[n] for n in w_names)

    in_specs = ([pl.BlockSpec((1, L, D), lambda b, l: (b, 0, 0)),      # x: constant over layers
                 pl.BlockSpec(mask.shape, lambda b, l: (0, 0))]        # mask: fetched once
                + [pl.BlockSpec((1,) + w.shape[1:], lambda b, l: (l, 0, 0))  # stream layer l
                   for w in weights])

    return pl.pallas_call(
        partial(_transformer_kernel, n_head),
        out_shape=jax.ShapeDtypeStruct((B, L, D), x.dtype),
        grid=(B, n_layers),
        in_specs=in_specs,
        out_specs=pl.BlockSpec((1, L, D), lambda b, l: (b, 0, 0)),     # accumulator over layers
        scratch_shapes=[pltpu.VMEM((L, D), jnp.float32)],
        compiler_params=pltpu.CompilerParams(
            dimension_semantics=("parallel", "arbitrary"),
            vmem_limit_bytes=48 * 1024 * 1024),
    )(x, mask, *weights)


# ---------------------------------------------------------------------------
# Kernel 2: vision tower (patch-embed matmul + mean pool) + image projector,
# gridded over the batch so patch tiles stream HBM->VMEM with double buffering.
# ---------------------------------------------------------------------------
def _vision_kernel(patches_ref, pw_ref, pb_ref, iw_ref, feats_ref, z_ref):
    pb = patches_ref[0].astype(jnp.float32)                                          # (P, K)
    emb = jnp.dot(pb, pw_ref[...], preferred_element_type=jnp.float32) + pb_ref[...]  # (P, Vw)
    feats = jnp.mean(emb, axis=0, keepdims=True)                                      # (1, Vw)
    feats_ref[0] = feats.astype(feats_ref.dtype)
    z_ref[0] = jnp.dot(feats, iw_ref[...], preferred_element_type=jnp.float32).astype(z_ref.dtype)


# ---------------------------------------------------------------------------
# Kernel 3: ln_final (on the gathered EOT rows) + text projector (no bias)
# ---------------------------------------------------------------------------
def _text_head_kernel(x_ref, lnw_ref, lnb_ref, tw_ref, feats_ref, z_ref):
    h = _layernorm(x_ref[...], lnw_ref[...], lnb_ref[...])                            # (B, D)
    feats_ref[...] = h.astype(feats_ref.dtype)
    z_ref[...] = jnp.dot(h, tw_ref[...], preferred_element_type=jnp.float32).astype(z_ref.dtype)


# ---------------------------------------------------------------------------
# parameter init (deterministic, mirrors CLIP.initialize_parameters stds).
# All linear weights stored pre-transposed ((in, out) layout); per-layer block
# weights stacked on a leading layer axis for weight streaming.
# ---------------------------------------------------------------------------
def init_params(key, *, embed_dim, vision_width, context_length, vocab_size,
                transformer_width, transformer_layers, in_chans, patch_size):
    D = transformer_width
    L = context_length
    nl = transformer_layers
    proj_std = D ** -0.5 * (2 * nl) ** -0.5
    attn_std = D ** -0.5
    fc_std = (2 * D) ** -0.5
    K = in_chans * patch_size * patch_size

    keys = jax.random.split(key, 9)
    params = {
        'tok_emb': 0.02 * jax.random.normal(keys[0], (vocab_size, D), jnp.float32),
        'pos_emb': 0.01 * jax.random.normal(keys[1], (L, D), jnp.float32),
        'ln_final_w': jnp.ones((1, D), jnp.float32),
        'ln_final_b': jnp.zeros((1, D), jnp.float32),
        'text_proj_w': (D ** -0.5) * jax.random.normal(keys[2], (D, embed_dim), jnp.float32),
        'img_proj_w': (vision_width ** -0.5) * jax.random.normal(keys[3], (vision_width, embed_dim), jnp.float32),
        'patch_w': (K ** -0.5) * jax.random.normal(keys[4], (K, vision_width), jnp.float32),
        'patch_b': jnp.zeros((1, vision_width), jnp.float32),
        'logit_scale': jnp.asarray(math.log(1.0 / 0.07), jnp.float32),
        'attn_mask': jnp.triu(jnp.full((L, L), -jnp.inf, jnp.float32), 1),
        'blocks': {
            'ln1_w': jnp.ones((nl, 1, D), jnp.float32),
            'ln1_b': jnp.zeros((nl, 1, D), jnp.float32),
            'in_w': attn_std * jax.random.normal(keys[5], (nl, D, 3 * D), jnp.float32),
            'in_b': jnp.zeros((nl, 1, 3 * D), jnp.float32),
            'out_w': proj_std * jax.random.normal(keys[6], (nl, D, D), jnp.float32),
            'out_b': jnp.zeros((nl, 1, D), jnp.float32),
            'ln2_w': jnp.ones((nl, 1, D), jnp.float32),
            'ln2_b': jnp.zeros((nl, 1, D), jnp.float32),
            'fc_w': fc_std * jax.random.normal(keys[7], (nl, D, 4 * D), jnp.float32),
            'fc_b': jnp.zeros((nl, 1, 4 * D), jnp.float32),
            'proj_w': proj_std * jax.random.normal(keys[8], (nl, 4 * D, D), jnp.float32),
            'proj_b': jnp.zeros((nl, 1, D), jnp.float32),
        },
    }
    return params


# ---------------------------------------------------------------------------
# CLIP.forward
# ---------------------------------------------------------------------------
def clip_forward(params, image, text, *, n_head, patch_size):
    D = params['tok_emb'].shape[1]
    Vw = params['patch_w'].shape[1]
    E = params['img_proj_w'].shape[1]

    # ---- encode_image ----
    B, C, H, W = image.shape
    p = patch_size
    # NCHW -> (B, P, C*p*p) patch flattening (same order as Conv2d weight flatten)
    patches = image.reshape(B, C, H // p, p, W // p, p)
    patches = patches.transpose(0, 2, 4, 1, 3, 5).reshape(B, (H // p) * (W // p), C * p * p)
    P, K = patches.shape[1], patches.shape[2]

    feats_image, z_image = pl.pallas_call(
        _vision_kernel,
        out_shape=(jax.ShapeDtypeStruct((B, 1, Vw), jnp.float32),
                   jax.ShapeDtypeStruct((B, 1, E), jnp.float32)),
        grid=(B,),
        in_specs=[
            pl.BlockSpec((1, P, K), lambda b: (b, 0, 0)),
            pl.BlockSpec((K, Vw), lambda b: (0, 0)),
            pl.BlockSpec((1, Vw), lambda b: (0, 0)),
            pl.BlockSpec((Vw, E), lambda b: (0, 0)),
        ],
        out_specs=(pl.BlockSpec((1, 1, Vw), lambda b: (b, 0, 0)),
                   pl.BlockSpec((1, 1, E), lambda b: (b, 0, 0))),
        compiler_params=pltpu.CompilerParams(dimension_semantics=("parallel",)),
    )(patches, params['patch_w'], params['patch_b'], params['img_proj_w'])
    feats_image = feats_image[:, 0, :]
    z_image = z_image[:, 0, :]

    # ---- encode_text (mode='global': dropout / drop_path are identity) ----
    Bt, L = text.shape
    eot = jnp.argmax(text, axis=-1)                       # eot_index = text.argmax(-1)
    x = params['tok_emb'][text] + params['pos_emb']       # embedding gather = JAX glue
    x = transformer_forward(x, params['attn_mask'], params['blocks'], n_head)
    feats_pre = x[jnp.arange(Bt), eot]                    # (B, D) gather = JAX glue
    feats_text, z_text = pl.pallas_call(
        _text_head_kernel,
        out_shape=(jax.ShapeDtypeStruct((Bt, D), jnp.float32),
                   jax.ShapeDtypeStruct((Bt, E), jnp.float32)),
    )(feats_pre, params['ln_final_w'], params['ln_final_b'], params['text_proj_w'])

    return {'feats_image': feats_image, 'z_image': z_image,
            'feats_text': feats_text, 'z_text': z_text,
            'logit_scale': jnp.exp(params['logit_scale'])}


# ---------------------------------------------------------------------------
if __name__ == "__main__":
    # small deterministic config
    B, C, HW, patch = 2, 3, 16, 8
    context_length = 8
    vocab_size = 100
    transformer_width = 64
    transformer_heads = 4
    transformer_layers = 2
    vision_width = 48
    embed_dim = 32

    root = jax.random.PRNGKey(0)
    k_params, k_img, k_txt = jax.random.split(root, 3)

    params = init_params(
        k_params,
        embed_dim=embed_dim, vision_width=vision_width,
        context_length=context_length, vocab_size=vocab_size,
        transformer_width=transformer_width, transformer_layers=transformer_layers,
        in_chans=C, patch_size=patch)

    image = jax.random.normal(k_img, (B, C, HW, HW), jnp.float32)
    text = jax.random.randint(k_txt, (B, context_length), 0, vocab_size, dtype=jnp.int32)

    out = clip_forward(params, image, text, n_head=transformer_heads, patch_size=patch)
    out = jax.block_until_ready(out)

    # sanity on shapes
    assert out['feats_image'].shape == (B, vision_width)
    assert out['z_image'].shape == (B, embed_dim)
    assert out['feats_text'].shape == (B, transformer_width)
    assert out['z_text'].shape == (B, embed_dim)
    assert out['logit_scale'].shape == ()
    assert bool(jnp.all(jnp.isfinite(out['z_text']))) and bool(jnp.all(jnp.isfinite(out['z_image'])))
    print("KERNEL_OK")
</pallas_src>

<mosaic_0001>
module attributes {stable_mosaic.version = 11 : i64} {
  func.func @_vision_kernel(%arg0: i32, %arg1: memref<1x4x192xf32, #tpu.memory_space<vmem>>, %arg2: memref<192x48xf32, #tpu.memory_space<vmem>>, %arg3: memref<1x48xf32, #tpu.memory_space<vmem>>, %arg4: memref<48x32xf32, #tpu.memory_space<vmem>>, %arg5: memref<1x1x48xf32, #tpu.memory_space<vmem>>, %arg6: memref<1x1x32xf32, #tpu.memory_space<vmem>>) attributes {dimension_semantics = [#tpu.dimension_semantics<parallel>], iteration_bounds = array<i64: 2>, scalar_prefetch = 0 : i64, scratch_operands = 0 : i64, tpu.core_type = #tpu.core_type<tc>, window_params = [{transform_indices = @transform_0, window_bounds = array<i64: 1, 4, 192>}, {pipeline_mode = #tpu.pipeline_mode<synchronous>, transform_indices = @transform_1, window_bounds = array<i64: 192, 48>}, {pipeline_mode = #tpu.pipeline_mode<synchronous>, transform_indices = @transform_2, window_bounds = array<i64: 1, 48>}, {pipeline_mode = #tpu.pipeline_mode<synchronous>, transform_indices = @transform_3, window_bounds = array<i64: 48, 32>}, {transform_indices = @transform_4, window_bounds = array<i64: 1, 1, 48>}, {transform_indices = @transform_5, window_bounds = array<i64: 1, 1, 32>}]} {
    %c0 = arith.constant 0 : index
    %c0_0 = arith.constant 0 : index
    %c0_1 = arith.constant 0 : index
    %0 = vector.load %arg1[%c0, %c0_0, %c0_1] : memref<1x4x192xf32, #tpu.memory_space<vmem>>, vector<1x4x192xf32>
    %1 = vector.shape_cast %0 : vector<1x4x192xf32> to vector<4x192xf32>
    %c0_2 = arith.constant 0 : index
    %c0_3 = arith.constant 0 : index
    %2 = vector.load %arg2[%c0_2, %c0_3] : memref<192x48xf32, #tpu.memory_space<vmem>>, vector<192x48xf32>
    %cst = arith.constant dense<0.000000e+00> : vector<4x48xf32>
    %3 = tpu.matmul %1, %2, %cst {dimension_numbers = #tpu.dot_dimension_numbers<[1], [0], [0], [1], [0, 0, 1, 1], [], []>} : vector<4x192xf32>, vector<192x48xf32>, vector<4x48xf32> -> vector<4x48xf32>
    %c0_4 = arith.constant 0 : index
    %c0_5 = arith.constant 0 : index
    %4 = vector.load %arg3[%c0_4, %c0_5] : memref<1x48xf32, #tpu.memory_space<vmem>>, vector<1x48xf32>
    %5 = vector.broadcast %4 : vector<1x48xf32> to vector<4x48xf32>
    %6 = arith.addf %3, %5 : vector<4x48xf32>
    %cst_6 = arith.constant dense<0.000000e+00> : vector<48xf32>
    %7 = vector.multi_reduction <add>, %6, %cst_6 [0] : vector<4x48xf32> to vector<48xf32>
    %8 = vector.shape_cast %7 : vector<48xf32> to vector<1x48xf32>
    %cst_7 = arith.constant 4.000000e+00 : f32
    %9 = vector.broadcast %cst_7 : f32 to vector<1x48xf32>
    %10 = arith.divf %8, %9 : vector<1x48xf32>
    %c0_8 = arith.constant 0 : index
    %c0_9 = arith.constant 0 : index
    %c0_10 = arith.constant 0 : index
    %11 = vector.load %arg5[%c0_8, %c0_9, %c0_10] : memref<1x1x48xf32, #tpu.memory_space<vmem>>, vector<1x1x48xf32>
    %12 = vector.shape_cast %11 : vector<1x1x48xf32> to vector<1x48xf32>
    %13 = vector.shape_cast %10 : vector<1x48xf32> to vector<1x1x48xf32>
    tpu.vector_store %arg5[%c0_8, %c0_9, %c0_10], %13 {strides = array<i32>} : memref<1x1x48xf32, #tpu.memory_space<vmem>>, vector<1x1x48xf32>,
    %c0_11 = arith.constant 0 : index
    %c0_12 = arith.constant 0 : index
    %14 = vector.load %arg4[%c0_11, %c0_12] : memref<48x32xf32, #tpu.memory_space<vmem>>, vector<48x32xf32>
    %cst_13 = arith.constant dense<0.000000e+00> : vector<1x32xf32>
    %15 = tpu.matmul %10, %14, %cst_13 {dimension_numbers = #tpu.dot_dimension_numbers<[1], [0], [0], [1], [0, 0, 1, 1], [], []>} : vector<1x48xf32>, vector<48x32xf32>, vector<1x32xf32> -> vector<1x32xf32>
    %c0_14 = arith.constant 0 : index
    %c0_15 = arith.constant 0 : index
    %c0_16 = arith.constant 0 : index
    %16 = vector.load %arg6[%c0_14, %c0_15, %c0_16] : memref<1x1x32xf32, #tpu.memory_space<vmem>>, vector<1x1x32xf32>
    %17 = vector.shape_cast %16 : vector<1x1x32xf32> to vector<1x32xf32>
    %18 = vector.shape_cast %15 : vector<1x32xf32> to vector<1x1x32xf32>
    tpu.vector_store %arg6[%c0_14, %c0_15, %c0_16], %18 {strides = array<i32>} : memref<1x1x32xf32, #tpu.memory_space<vmem>>, vector<1x1x32xf32>,
    return
  }
  func.func @transform_0(%arg0: i32) -> (i32, i32, i32) {
    %c0_i32 = arith.constant 0 : i32
    %c0_i32_0 = arith.constant 0 : i32
    %c0_i32_1 = arith.constant 0 : i32
    return %arg0, %c0_i32, %c0_i32_0 : i32, i32, i32
  }
  func.func @transform_1(%arg0: i32) -> (i32, i32) {
    %c0_i32 = arith.constant 0 : i32
    %c0_i32_0 = arith.constant 0 : i32
    %c0_i32_1 = arith.constant 0 : i32
    return %c0_i32, %c0_i32_0 : i32, i32
  }
  func.func @transform_2(%arg0: i32) -> (i32, i32) {
    %c0_i32 = arith.constant 0 : i32
    %c0_i32_0 = arith.constant 0 : i32
    %c0_i32_1 = arith.constant 0 : i32
    return %c0_i32, %c0_i32_0 : i32, i32
  }
  func.func @transform_3(%arg0: i32) -> (i32, i32) {
    %c0_i32 = arith.constant 0 : i32
    %c0_i32_0 = arith.constant 0 : i32
    %c0_i32_1 = arith.constant 0 : i32
    return %c0_i32, %c0_i32_0 : i32, i32
  }
  func.func @transform_4(%arg0: i32) -> (i32, i32, i32) {
    %c0_i32 = arith.constant 0 : i32
    %c0_i32_0 = arith.constant 0 : i32
    %c0_i32_1 = arith.constant 0 : i32
    return %arg0, %c0_i32, %c0_i32_0 : i32, i32, i32
  }
  func.func @transform_5(%arg0: i32) -> (i32, i32, i32) {
    %c0_i32 = arith.constant 0 : i32
    %c0_i32_0 = arith.constant 0 : i32
    %c0_i32_1 = arith.constant 0 : i32
    return %arg0, %c0_i32, %c0_i32_0 : i32, i32, i32
  }
}

</mosaic_0001>

<bundles_post_ra>
// kernel: tpu_custom_call.1
= control target key start
LH: loop header
LB: loop body
LE: loop exit
PB: predicated region body
PF: predicated region fallthrough
CT: control target
= control target key end

     0   :  { %11 = vsyncpa [#allocation3], 0  ;;  %s856_s0 = inlined_call_operand.vmem [shape: f32[2,4,192], index: 0, kind: input, shape index: {}]   ;;  %s857_s1 = inlined_call_operand.vmem [shape: f32[192,48], index: 1, kind: input, shape index: {}]   ;;  %s858_s2 = inlined_call_operand.vmem [shape: f32[1,48], index: 2, kind: input, shape index: {}]   ;;  %s859_s3 = inlined_call_operand.vmem [shape: f32[48,32], index: 3, kind: input, shape index: {}]   ;;  %s860_s4 = inlined_call_operand.hbm [shape: f32[2,1,48], index: 4, kind: output, shape index: {0}]   ;;  %s861_s5 = inlined_call_operand.hbm [shape: f32[2,1,32], index: 5, kind: output, shape index: {1}]  }
   0x1   :  { %13 = vsyncpa [#allocation3 + $0x1], 0 }
   0x2   :  { %14 = vsyncpa [#allocation5], 0 }
   0x3   :  { %16 = vsyncpa [#allocation5 + $0x1], 0  ;;  %s658_s18 = smov 0   ;;  %s660_s19 = smov 0  }
   0x4   :  { %s662_s20 = smov 0   ;;  %s664_s21 = smov 0  }
   0x5 LB: > { %s679_s22 = sadd.s32 4294967295, %s625_s21   ;;  %s472_s23 = sadd.s32 4294967294, %s625_s21   ;;  %s625_s21 = sphi %s664_s21, %s867_s21   ;;  %s621_s20 = sphi %s662_s20, %s866_s20   ;;  %s617_s19 = sphi %s660_s19, %s865_s19   ;;  %s613_s18 = sphi %s658_s18, %s864_s18  }
   0x6   : > { %s683_s24 = sadd.s32 1, %s625_s21   ;;  %s118_s25 = sadd.s32 1, %s621_s20 }
   0x7   : > { %s115_s26 = ssub.s32 %s625_s21, %s683_s24  ;;  %p128_p0 = scmp.ne.s32.totalorder %s621_s20, %s617_s19 }
   0x8   : > { %p116_p1 = scmp.eq.s32.totalorder %s115_s26, 0  ;;  %p129_p2 = scmp.eq.s32.totalorder %s679_s22, 1 }
   0x9   : > { %p134_p3 = scmp.ne.s32.totalorder %s617_s19, %s613_s18  ;;  %p135_p4 = scmp.eq.s32.totalorder %s472_s23, 1 }
   0xa   : > { %s694_s27 = scalar_select %p116_p1, %s621_s20, %s118_s25  }
   0xb   : > { %p696_p5 = por %p129_p2, %p128_p0  ;;  %p700_p6 = por %p135_p4, %p134_p3 }
   0xc   : > { %p475_p7 = scmp.ge.s32.totalorder %s625_s21, 1  ;;  %p196_p8 = scmp.lt.s32.totalorder %s625_s21, 3 }
   0xe   : > { %p197_p9 = pnand %p475_p7, %p196_p8 }
   0xf   : > { %p227_p10 = scmp.lt.s32.totalorder (!%p197_p9), %s679_s22, 1  ;;  %s805_s8 = sand.u32 (!%p197_p9), 1, %s617_s19  }
  0x10   : > { %200 = sbr.rel (%p197_p9) target bundleno = 333 (0x14d), region = 36  ;;  %s220_s9 = scalar_lea.vmem (!%p197_p9), [#allocation2], %s805_s8 }
  0x11   : > { %s374_s13 = sshll.u32 (!%p197_p9), %s220_s9, 4  ;;  %s360_s15 = scalar_lea.sflag (!%p197_p9), [#allocation3], %s805_s8  ;;  %s375_s13 = int_to_ptr.vmem [resolvable:$true] %s374_s13 }
  0x12   : > { %s551_s26 = scalar_lea.hbm (!%p197_p9), %s860_s4, 2 }
  0x15   : > { %v248_v0 = vld [vmem:[%s857_s1 + $0x78] sm:$0xff]  ;;  %v247_v1 = vld [vmem:[%s857_s1 + $0x70] sm:$0xff]  ;;  %v246_v2 = vld [vmem:[%s857_s1 + $0x68] sm:$0xff]  ;;  %s228_s11 = scalar_select %p227_p10, %s679_s22, 1  ;;  %vm266_vm0 = vcmask 523264   ;;  %v627_v33 = vmov 4.0  }
  0x16   : > { %269 = vmatpush.msra.mxu0 %v248_v0  ;;  %v256_v3 = vld [vmem:[%s857_s1 + $0xb8] sm:$0xff]  ;;  %v245_v4 = vld [vmem:[%s857_s1 + $0x60] sm:$0xff]  ;;  %v255_v5 = vld [vmem:[%s857_s1 + $0xb0] sm:$0xff]  ;;  %529 = vrcp.f32 %v627_v33  ;;  %vm309_vm1 = vcmask 388096   ;;  %vm333_vm3 = vcmask 392192   ;;  %vm325_vm4 = vcmask 385024  }
  0x17   : > { %297 = vmatpush.msra.mxu1 %v256_v3  ;;  %s482_s23 = sshll.u32 %s228_s11, 3  ;;  %v254_v6 = vld [vmem:[%s857_s1 + $0xa8] sm:$0xff]  ;;  %v244_v7 = vld [vmem:[%s857_s1 + $0x58] sm:$0xff]  ;;  %v253_v8 = vld [vmem:[%s857_s1 + $0xa0] sm:$0xff]  ;;  %s372_s11 = scalar_lea.hbm %s860_s4, %s679_s22 }
  0x18   : > { %270 = vmatpush.msra.mxu0 %v247_v1  ;;  %s231_s7 = scalar_lea.vmem %s856_s0, %s482_s23  ;;  %v243_v10 = vld [vmem:[%s857_s1 + $0x50] sm:$0xff]  ;;  %v252_v11 = vld [vmem:[%s857_s1 + $0x98] sm:$0xff]  ;;  %v242_v12 = vld [vmem:[%s857_s1 + $0x48] sm:$0xff]  ;;  %s376_s14 = sshll.u32 %s372_s11, 4  ;;  %s377_s14 = int_to_ptr.hbm [resolvable:$true] %s376_s14 }
  0x19   : > { %298 = vmatpush.msra.mxu1 %v255_v5  ;;  %v232_v9 = vld [vmem:[%s231_s7] sm:$0xff]  ;;  %v251_v13 = vld [vmem:[%s857_s1 + $0x90] sm:$0xff]  ;;  %v250_v15 = vld [vmem:[%s857_s1 + $0x88] sm:$0xff]  ;;  %s545_s16 = sshra.s32 %s377_s14, 4  ;;  %s546_s16 = int_to_ptr.hbm [resolvable:$true] %s545_s16 }
  0x1a   : > { %271 = vmatpush.msra.mxu0 %v246_v2  ;;  %262 = vst [vmem:[#allocation1] ss:$2 sm:$0xff] %v232_v9  ;;  %v241_v14 = vld [vmem:[%s857_s1 + $0x40] sm:$0xff]  ;;  %v240_v16 = vld [vmem:[%s857_s1 + $0x38] sm:$0xff]  ;;  %v239_v18 = vld [vmem:[%s857_s1 + $0x30] sm:$0xff]  ;;  %s547_s17 = scalar_lea.hbm %s546_s16, 1  ;;  %p552_p0 = scmp.lt.s32.totalorder %s546_s16, %s860_s4 }
  0x1b   : > { %299 = vmatpush.msra.mxu1 %v254_v6  ;;  %v249_v17 = vld [vmem:[%s857_s1 + $0x80] sm:$0xff]  ;;  %v238_v20 = vld [vmem:[%s857_s1 + $0x28] sm:$0xff]  ;;  %v236_v22 = vld [vmem:[%s857_s1 + $0x18] sm:$0xff]  ;;  %p548_p11 = scmp.ne.s32.totalorder %s546_s16, %s547_s17  ;;  %p553_p1 = scmp.lt.s32.totalorder %s551_s26, %s547_s17 }
  0x1c   : > { %272 = vmatpush.msra.mxu0 %v245_v4  ;;  %v237_v21 = vld [vmem:[%s857_s1 + $0x20] sm:$0xff]  ;;  %v235_v23 = vld [vmem:[%s857_s1 + $0x10] sm:$0xff]  ;;  %v234_v24 = vld [vmem:[%s857_s1 + $0x8] sm:$0xff]  ;;  %v530_v34 = vpop.eup %529 }
  0x1d   : > { %300 = vmatpush.msra.mxu1 %v253_v8  ;;  %v233_v25 = vld [vmem:[%s857_s1] sm:$0xff]  ;;  %v332_v27 = vld [vmem:[%s859_s3 + $0x28] sm:$0xff]  ;;  %v330_v29 = vld [vmem:[%s859_s3 + $0x18] sm:$0xff]  ;;  %v318_v36 = vmul.f32 4.0, %v530_v34  ;;  %vm322_vm2 = vweird.f32 %v530_v34  ;;  %p549_p12 = pnand %p548_p11, %p696_p5  ;;  %p554_p2 = por %p553_p1, %p552_p0 }
  0x1e   : > { %273 = vmatpush.msra.mxu0 %v244_v7  ;;  %347 = vmatpush.msra.mxu2 %v332_v27  ;;  %v331_v28 = vld [vmem:[%s859_s3 + $0x20] sm:$0xff]  ;;  %v329_v30 = vld [vmem:[%s859_s3 + $0x10] sm:$0xff]  ;;  %v328_v31 = vld [vmem:[%s859_s3 + $0x8] sm:$0xff] }
  0x1f   : > { %301 = vmatpush.msra.mxu1 %v252_v11  ;;  %v327_v32 = vld [vmem:[%s859_s3] sm:$0xff]  ;;  %v319_v41 = vsub.f32 1.0, %v318_v36  ;;  %p550_p13 = pneg %p549_p12 }
  0x20   : > { %274 = vmatpush.msra.mxu0 %v243_v10  ;;  %348 = vmatpush.msra.mxu2 %v331_v28  ;;  %v528_v35 = vld [vmem:[%s858_s2] ss:$0 sm:$0xff] }
  0x21   : > { %302 = vmatpush.msra.mxu1 %v251_v13  ;;  %v264_v19 = vld.sshfl [vmem:[#allocation1 + $0x8] sm:$0xff pattern:$0x75316420]  ;;  %v263_v26 = vld.sshfl [vmem:[#allocation1] sm:$0xff pattern:$0x75316420]  ;;  %v320_v44 = vmul.f32 %v530_v34, %v319_v41  ;;  %p555_p3 = pnand %p554_p2, %p550_p13 }
  0x22   : > { %275 = vmatpush.msra.mxu0 %v242_v12  ;;  %349 = vmatpush.msra.mxu2 %v330_v29 }
  0x23   : > { %303 = vmatpush.msra.mxu1 %v250_v15  ;;  %v321_v47 = vadd.f32 %v530_v34, %v320_v44 }
  0x24   : > { %276 = vmatpush.msra.mxu0 %v241_v14  ;;  %350 = vmatpush.msra.mxu2 %v329_v30 }
  0x25   : > { %304 = vmatpush.msra.mxu1 %v249_v17  ;;  %v323_v50 = vsel %vm322_vm2, %v530_v34, %v321_v47 }
  0x26   : > { %277 = vmatpush.msra.mxu0 %v240_v16  ;;  %478 = vmatmul.msk.f32.vlgmr.msra.gmra.mxu1 %vm266_vm0, %v264_v19 }
  0x27   : > { %351 = vmatpush.msra.mxu2 %v328_v31 }
  0x28   : > { %278 = vmatpush.msra.mxu0 %v239_v18 }
  0x29   : > { %352 = vmatpush.msra.mxu2 %v327_v32 }
  0x2a   : > { %279 = vmatpush.msra.mxu0 %v238_v20 }
  0x2c   : > { %280 = vmatpush.msra.mxu0 %v237_v21 }
  0x2e   : > { %281 = vmatpush.msra.mxu0 %v236_v22 }
  0x30   : > { %282 = vmatpush.msra.mxu0 %v235_v23 }
  0x32   : > { %283 = vmatpush.msra.mxu0 %v234_v24 }
  0x34   : > { %284 = vmatpush.msra.mxu0 %v233_v25 }
  0x35   : > { %285 = vmatmul.f32.vlgmr.msra.gmra.mxu0 %v263_v26 }
  0xa3   : > { %v306_v38 = vpop.f32.mrf.mxu1 }
  0xb2   : > { %v286_v37 = vpop.f32.mrf.mxu0 }
  0xb3   : > { %v287_v39 = vadd.f32 %v528_v35, %v286_v37 }
  0xb5   : > { %v307_v40 = vadd.f32 %v306_v38, %v287_v39 }
  0xb7   : > { %v310_v42 = vsel %vm309_vm1, %v307_v40, 0.0 }
  0xb8   : > { %v311_v43 = vrot.slane %v310_v42, 4 }
  0xba   : > { %v312_v45 = vadd.f32 %v311_v43, %v310_v42 }
  0xbc   : > { %v313_v46 = vrot.slane %v312_v45, 2 }
  0xbe   : > { %v314_v48 = vadd.f32 %v313_v46, %v312_v45 }
  0xc0   : > { %v315_v49 = vrot.slane %v314_v48, 1 }
  0xc2   : > { %v316_v51 = vadd.f32 %v315_v49, %v314_v48 }
  0xc4   : > { %v324_v52 = vmul.f32 %v323_v50, %v316_v51 }
  0xc6   : > { %479 = vmatmul.msk.f32.vlgmr.msra.gmra.mxu2 %vm333_vm3, %v324_v52  ;;  %326 = vst.msk [vmem:[%s220_s9] sm:$0x1] %vm325_vm4, %v324_v52 }
  0xc7   : > { %558 = shalt.err (!%p555_p3)
}
  0xc8   : > { %483 = dma.vmem_to_hbm [thread:$0]  (%p696_p5), %s375_s13, 16, %s377_s14, %s360_s15   ;;  %vm357_vm5 = vcmask 253952  }
  0xc9   : > { %s385_s10 = scalar_lea.hbm %s861_s5, %s679_s22  ;;  %s226_s12 = scalar_lea.vmem [#allocation4], %s805_s8 }
  0xca   : > { %s387_s11 = sshll.u32 %s226_s12, 4  ;;  %s389_s23 = sshll.u32 %s385_s10, 4  ;;  %s388_s11 = int_to_ptr.vmem [resolvable:$true] %s387_s11  ;;  %s390_s23 = int_to_ptr.hbm [resolvable:$true] %s389_s23 }
  0xcb   : > { %s364_s16 = scalar_lea.sflag [#allocation5], %s805_s8  ;;  %s573_s17 = sshra.s32 %s390_s23, 4  ;;  %s574_s17 = int_to_ptr.hbm [resolvable:$true] %s573_s17 }
  0xcc   : > { %s575_s25 = scalar_lea.hbm %s574_s17, 1  ;;  %s579_s22 = scalar_lea.hbm %s861_s5, 2 }
  0xcd   : > { %p576_p4 = scmp.ne.s32.totalorder %s574_s17, %s575_s25  ;;  %p580_p9 = scmp.lt.s32.totalorder %s574_s17, %s861_s5 }
  0xce   : > { %p581_p10 = scmp.lt.s32.totalorder %s579_s22, %s575_s25 }
  0xcf   : > { %p577_p7 = pnand %p576_p4, %p696_p5 }
  0xd0   : > { %p582_p11 = por %p581_p10, %p580_p9 }
  0xd1   : > { %p578_p8 = pneg %p577_p7 }
  0xd3   : > { %p583_p12 = pnand %p582_p11, %p578_p8 }
 0x149   : > { %v354_v53 = vpop.f32.mrf.mxu2 }
 0x14a   : > { %358 = vst.msk [vmem:[%s226_s12] sm:$0x1] %vm357_vm5, %v354_v53 }
 0x14b   : > { %586 = shalt.err (!%p583_p12)
}
 0x14c   : > { %484 = dma.vmem_to_hbm [thread:$0]  (%p696_p5), %s388_s11, 16, %s390_s23, %s364_s16  }
 0x14d PF: > { %p494_p13 = scmp.ge.s32.totalorder %s625_s21, 2  ;;  %s401_s8 = sand.u32 1, %s613_s18  }
 0x14e   : > { %s402_s30 = scalar_lea.sflag [#allocation3], %s401_s8 }
 0x14f   : > { %p488_p0 = pnand %p494_p13, %p700_p6 }
 0x151   : > { %p489_p1 = pneg %p488_p0 }
 0x153   : > { %604 = dma.done.wait (%p489_p1), %s402_s30, 16  }
 0x154   : > { %606 = vsyncadd (%p489_p1), %s402_s30, 4294967280  ;;  %s411_s6 = scalar_lea.sflag [#allocation5], %s401_s8 }
 0x155   : > { %608 = dma.done.wait (%p489_p1), %s411_s6, 16  }
 0x156   : > { %610 = vsyncadd (%p489_p1), %s411_s6, 4294967280  ;;  %p19_p5 = scmp.ge.s32.totalorder %s683_s24, 4   ;;  %s864_s18 = smov %s617_s19 }
 0x157   : > { %s865_s19 = smov %s621_s20  ;;  %s866_s20 = smov %s694_s27 }
 0x158   : > { %s867_s21 = smov %s683_s24  ;;  %21 = sbr.rel (!%p19_p5) target bundleno = 5 (0x5), region = 88 }
 0x15d   :  { %416 = vsyncpa [#allocation3], 1 }
 0x15e   :  { %418 = vsyncpa [#allocation3 + $0x1], 1 }
 0x15f   :  { %419 = vsyncpa [#allocation5], 1 }
 0x160   :  { %421 = vsyncpa [#allocation5 + $0x1], 1 }

</bundles_post_ra>
